<compile_context>
chip_gen: v6e
topology: v6e:2x2x1
jax: 0.10.0
libtpu: 0.0.40
codegen_flags: <defaults>
</compile_context>

<pallas_src>
import math

import jax
import jax.numpy as jnp
from jax.experimental import pallas as pl
from jax.experimental.pallas import tpu as pltpu


def _make_pe(d_model: int, max_len: int = 5000, dtype=jnp.float32) -> jnp.ndarray:
    """Sinusoidal position-encoding buffer, shape [max_len, 1, d_model].

    Computed in f32, then cast once (at init) to the activation dtype.
    Matches the PyTorch recipe for even d_model (odd d_model truncates the cos
    half; the reference module would shape-error there).
    """
    position = jnp.arange(max_len, dtype=jnp.float32)[:, None]                       # [L, 1]
    div_term = jnp.exp(
        jnp.arange(0, d_model, 2, dtype=jnp.float32) * (-math.log(10000.0) / d_model)
    )                                                                                 # [ceil(D/2)]
    angles = position * div_term                                                      # [L, ceil(D/2)]
    pe = jnp.zeros((max_len, 1, d_model), dtype=jnp.float32)
    pe = pe.at[:, 0, 0::2].set(jnp.sin(angles))
    pe = pe.at[:, 0, 1::2].set(jnp.cos(angles[:, : d_model // 2]))
    return pe.astype(dtype)


def _pe_add_kernel(x_ref, pe_ref, o_ref):
    # x_ref: (ts, tb, D); pe_ref: (ts, D).
    # Broadcast pe over the batch (sublane) dim in-vreg: cheap VPU/XLU filler
    # that hides under the DMA-bound streaming loop.
    o_ref[...] = x_ref[...] + jnp.expand_dims(pe_ref[...], 1)


def _round_up(n: int, m: int) -> int:
    return ((n + m - 1) // m) * m


def _choose_tiles(S: int, B: int, D: int, itemsize: int, target_bytes: int):
    """Pick (ts, tb) so each x block is ~target_bytes.

    tb is either the full batch (always a legal block extent) or a multiple of
    the dtype's sublane-packing factor; ts is a multiple of 8 so the pe (ts, D)
    block stays legal for any S.
    """
    sub = max(8, 32 // itemsize)          # 8 for f32, 16 for bf16, 32 for int8
    row_bytes = D * itemsize

    # Tile the batch dim only when it divides the packing factor cleanly AND a
    # minimal seq tile with full batch would already exceed the target
    # (i.e. wide rows that would otherwise blow VMEM).
    if B % sub == 0 and sub * B * row_bytes > target_bytes:
        tb = max(sub, (target_bytes // (sub * row_bytes)) // sub * sub)
        tb = min(tb, B)
    else:
        tb = B

    block_row_bytes = max(tb * row_bytes, 1)
    ts = max(8, (target_bytes // block_row_bytes) // 8 * 8)
    ts = min(ts, _round_up(S, 8))

    # Keep >= 2 grid steps when S allows it so the "parallel" seq axis can be
    # split across v7x's two TensorCores (each with its own HBM path).
    if pl.cdiv(S, ts) * pl.cdiv(B, tb) == 1 and S > 8:
        ts = _round_up(pl.cdiv(S, 2), 8)
    return ts, tb


def positional_encoding_forward(
    x: jnp.ndarray,
    pe: jnp.ndarray,
    *,
    donate_x: bool = False,
    target_block_bytes: int = 8 * 1024 * 1024,
) -> jnp.ndarray:
    """x: [seq_len, batch, d_model]; pe: [max_len, 1, d_model] or [max_len, d_model]."""
    S, B, D = x.shape
    if pe.ndim == 3:
        pe = pe.reshape(pe.shape[0], pe.shape[2])     # squeeze axis 1: free, no copy
    if pe.dtype != x.dtype:
        pe = pe.astype(x.dtype)                       # no-op if built with x.dtype at init

    itemsize = jnp.dtype(x.dtype).itemsize
    ts, tb = _choose_tiles(S, B, D, itemsize, target_block_bytes)

    # Explicit VMEM budget: ~2.5x the per-step (x + out + pe) block bytes
    # (covers the default double-buffering plus slack), floored so tiny shapes
    # don't under-provision compiler scratch, capped well under any physical
    # VMEM we'd want to rely on.
    x_block = ts * tb * D * itemsize
    pe_block = ts * D * itemsize
    vmem_limit = int(2.5 * (2 * x_block + pe_block))
    vmem_limit = min(max(vmem_limit, 8 * 1024 * 1024), 100 * 1024 * 1024)

    grid = (pl.cdiv(S, ts), pl.cdiv(B, tb))
    return pl.pallas_call(
        _pe_add_kernel,
        out_shape=jax.ShapeDtypeStruct((S, B, D), x.dtype),
        grid=grid,
        in_specs=[
            pl.BlockSpec((ts, tb, D), lambda i, j: (i, j, 0)),
            # Dense 2-D pe tile; same block revisited across the batch axis, so
            # Pallas skips the redundant DMA.
            pl.BlockSpec((ts, D), lambda i, j: (i, 0)),
        ],
        out_specs=pl.BlockSpec((ts, tb, D), lambda i, j: (i, j, 0)),
        compiler_params=pltpu.CompilerParams(
            dimension_semantics=("parallel", "parallel"),
            vmem_limit_bytes=vmem_limit,
        ),
        input_output_aliases=({0: 0} if donate_x else {}),
    )(x, pe)


if __name__ == "__main__":
    key = jax.random.PRNGKey(0)

    # --- Shapes implied by the module: [seq_len, batch, d_model] = [8, 2, 32] ---
    seq_len, batch, d_model = 8, 2, 32
    x = jax.random.normal(key, (seq_len, batch, d_model), dtype=jnp.float32)
    pe = _make_pe(d_model, max_len=5000, dtype=x.dtype)

    out = jax.block_until_ready(positional_encoding_forward(x, pe))
    ref = x + pe[:seq_len]
    assert out.shape == (seq_len, batch, d_model)
    assert jnp.allclose(out, ref, atol=1e-6, rtol=1e-6)

    # --- Lane-dense path (D % 128 == 0, B % 8 == 0); grid splits along seq ---
    s2, b2, d2 = 16, 8, 128
    x2 = jax.random.normal(jax.random.PRNGKey(1), (s2, b2, d2), dtype=jnp.float32)
    pe2 = _make_pe(d2, max_len=5000, dtype=x2.dtype)
    out2 = jax.block_until_ready(positional_encoding_forward(x2, pe2))
    assert jnp.allclose(out2, x2 + pe2[:s2], atol=1e-6, rtol=1e-6)

    print("KERNEL_OK")
</pallas_src>

<mosaic_0001>
module attributes {stable_mosaic.version = 11 : i64} {
  func.func @_pe_add_kernel(%arg0: i32, %arg1: i32, %arg2: memref<8x2x32xf32, #tpu.memory_space<vmem>>, %arg3: memref<8x32xf32, #tpu.memory_space<vmem>>, %arg4: memref<8x2x32xf32, #tpu.memory_space<vmem>>) attributes {dimension_semantics = [#tpu.dimension_semantics<parallel>, #tpu.dimension_semantics<parallel>], iteration_bounds = array<i64: 1, 1>, scalar_prefetch = 0 : i64, scratch_operands = 0 : i64, tpu.core_type = #tpu.core_type<tc>, window_params = [{transform_indices = @transform_0, window_bounds = array<i64: 8, 2, 32>}, {transform_indices = @transform_1, window_bounds = array<i64: 8, 32>}, {transform_indices = @transform_2, window_bounds = array<i64: 8, 2, 32>}]} {
    %c0 = arith.constant 0 : index
    %c0_0 = arith.constant 0 : index
    %c0_1 = arith.constant 0 : index
    %0 = vector.load %arg2[%c0, %c0_0, %c0_1] : memref<8x2x32xf32, #tpu.memory_space<vmem>>, vector<8x2x32xf32>
    %c0_2 = arith.constant 0 : index
    %c0_3 = arith.constant 0 : index
    %1 = vector.load %arg3[%c0_2, %c0_3] : memref<8x32xf32, #tpu.memory_space<vmem>>, vector<8x32xf32>
    %2 = vector.shape_cast %1 : vector<8x32xf32> to vector<8x1x32xf32>
    %3 = vector.broadcast %2 : vector<8x1x32xf32> to vector<8x2x32xf32>
    %4 = arith.addf %0, %3 : vector<8x2x32xf32>
    %c0_4 = arith.constant 0 : index
    %c0_5 = arith.constant 0 : index
    %c0_6 = arith.constant 0 : index
    %5 = vector.load %arg4[%c0_4, %c0_5, %c0_6] : memref<8x2x32xf32, #tpu.memory_space<vmem>>, vector<8x2x32xf32>
    tpu.vector_store %arg4[%c0_4, %c0_5, %c0_6], %4 {strides = array<i32>} : memref<8x2x32xf32, #tpu.memory_space<vmem>>, vector<8x2x32xf32>,
    return
  }
  func.func @transform_0(%arg0: i32, %arg1: i32) -> (i32, i32, i32) {
    %c0_i32 = arith.constant 0 : i32
    %c0_i32_0 = arith.constant 0 : i32
    return %arg0, %arg1, %c0_i32 : i32, i32, i32
  }
  func.func @transform_1(%arg0: i32, %arg1: i32) -> (i32, i32) {
    %c0_i32 = arith.constant 0 : i32
    %c0_i32_0 = arith.constant 0 : i32
    return %arg0, %c0_i32 : i32, i32
  }
  func.func @transform_2(%arg0: i32, %arg1: i32) -> (i32, i32, i32) {
    %c0_i32 = arith.constant 0 : i32
    %c0_i32_0 = arith.constant 0 : i32
    return %arg0, %arg1, %c0_i32 : i32, i32, i32
  }
}

</mosaic_0001>

<bundles_post_ra>
// kernel: tpu_custom_call.1
= control target key start
LH: loop header
LB: loop body
LE: loop exit
PB: predicated region body
PF: predicated region fallthrough
CT: control target
= control target key end

     0   :  { %v26_v1 = vlaneseq  ;;  %v170_v2 = vmov 1966171168   ;;  %s227_s0 = inlined_call_operand.vmem [shape: f32[8,2,32], index: 0, kind: input, shape index: {}]   ;;  %s228_s1 = inlined_call_operand.vmem [shape: f32[5000,32], index: 1, kind: input, shape index: {}]   ;;  %s229_s2 = inlined_call_operand.hbm [shape: f32[8,2,32], index: 2, kind: output, shape index: {}]  }
   0x1   :  { %v20_v0 = vld [vmem:[%s228_s1] sm:$0xff]  ;;  %v24_v3 = vunpack.c.l.s4 %v170_v2 }
   0x2   :  { %v27_v4 = vshrl.u32 %v26_v1, 7  ;;  %v22_v6 = vcombine.high %v20_v0, %v20_v0 }
   0x3   :  { %v25_v5 = vunpack.c.0.s8 %v24_v3 }
   0x4   :  { %7 = vsyncpa [#allocation3], 0  ;;  %v73_v9 = vsub.s32 0, %v27_v4  ;;  %v12_v15 = vld [vmem:[%s227_s0] sm:$0x3]  ;;  %vm119_vm0 = vcmask 254976  }
   0x5   :  { %v28_v7 = vsub.s32 %v25_v5, %v27_v4  ;;  %v16_v19 = vld [vmem:[%s227_s0 + $0x8] sm:$0x3]  ;;  %v13_v21 = vld [vmem:[%s227_s0 + $0x2] sm:$0x3]  ;;  %v14_v22 = vld [vmem:[%s227_s0 + $0x4] sm:$0x3] }
   0x6   :  { %v17_v29 = vld [vmem:[%s227_s0 + $0xa] sm:$0x3]  ;;  %v18_v30 = vld [vmem:[%s227_s0 + $0xc] sm:$0x3]  ;;  %v15_v31 = vld [vmem:[%s227_s0 + $0x6] sm:$0x3] }
   0x7   :  { %v29_v8 = vrot.slane %v20_v0, %v28_v7  ;;  %v36_v10 = vrot.slane %v22_v6, %v28_v7  ;;  %v19_v39 = vld [vmem:[%s227_s0 + $0xe] sm:$0x3]  ;;  %s171_s26 = smov [#allocation2]  }
   0x8   :  { %s133_s27 = sshll.u32 %s171_s26, 4  ;;  %s134_s27 = int_to_ptr.vmem [resolvable:$true] %s133_s27 }
   0x9   :  { %v45_v11 = vrot.slane %v29_v8, %v28_v7  ;;  %v37_v12 = vcombine.high %v29_v8, %v29_v8  ;;  %v52_v13 = vrot.slane %v36_v10, %v28_v7  ;;  %v38_v14 = vcombine.high %v36_v10, %v36_v10  ;;  %s148_s0 = scalar_lea.vmem %s134_s27, 256  ;;  %p153_p1 = scmp.lt.s32.totalorder %s134_s27, %s134_s27 }
   0xa   :  { %p149_p0 = scmp.ne.s32.totalorder %s134_s27, %s148_s0  ;;  %p154_p2 = scmp.lt.s32.totalorder %s148_s0, %s148_s0 }
   0xb   :  { %v74_v16 = vrot.slane %v45_v11, %v73_v9  ;;  %v59_v17 = vrot.slane %v37_v12, %v28_v7  ;;  %v67_v18 = vcombine.high %v45_v11, %v45_v11  ;;  %v90_v20 = vrot.slane %v52_v13, %v73_v9 }
   0xc   :  { %v66_v23 = vrot.slane %v38_v14, %v28_v7  ;;  %v68_v24 = vcombine.high %v52_v13, %v52_v13  ;;  %p155_p3 = por %p154_p2, %p153_p1 }
   0xd   :  { %v111_v25 = vadd.f32 %v74_v16, %v12_v15  ;;  %v78_v26 = vrot.slane %v59_v17, %v73_v9  ;;  %v82_v27 = vrot.slane %v67_v18, %v73_v9  ;;  %v69_v28 = vcombine.high %v59_v17, %v59_v17 }
   0xe   :  { %v115_v32 = vadd.f32 %v90_v20, %v16_v19  ;;  %v94_v33 = vrot.slane %v66_v23, %v73_v9  ;;  %v98_v34 = vrot.slane %v68_v24, %v73_v9  ;;  %v70_v35 = vcombine.high %v66_v23, %v66_v23  ;;  %p156_p4 = pnand %p155_p3, %p149_p0 }
   0xf   :  { %120 = vst.msk [vmem:[#allocation2] sm:$0x3] %vm119_vm0, %v111_v25  ;;  %v112_v36 = vadd.f32 %v78_v26, %v13_v21  ;;  %v113_v37 = vadd.f32 %v82_v27, %v14_v22  ;;  %v86_v38 = vrot.slane %v69_v28, %v73_v9 }
  0x10   :  { %124 = vst.msk [vmem:[#allocation2 + $0x8] sm:$0x3] %vm119_vm0, %v115_v32  ;;  %v116_v40 = vadd.f32 %v94_v33, %v17_v29  ;;  %v117_v41 = vadd.f32 %v98_v34, %v18_v30  ;;  %v102_v42 = vrot.slane %v70_v35, %v73_v9 }
  0x11   :  { %121 = vst.msk [vmem:[#allocation2 + $0x2] sm:$0x3] %vm119_vm0, %v112_v36  ;;  %122 = vst.msk [vmem:[#allocation2 + $0x4] sm:$0x3] %vm119_vm0, %v113_v37  ;;  %v114_v43 = vadd.f32 %v86_v38, %v15_v31 }
  0x12   :  { %125 = vst.msk [vmem:[#allocation2 + $0xa] sm:$0x3] %vm119_vm0, %v116_v40  ;;  %126 = vst.msk [vmem:[#allocation2 + $0xc] sm:$0x3] %vm119_vm0, %v117_v41  ;;  %v118_v44 = vadd.f32 %v102_v42, %v19_v39 }
  0x13   :  { %123 = vst.msk [vmem:[#allocation2 + $0x6] sm:$0x3] %vm119_vm0, %v114_v43 }
  0x14   :  { %127 = vst.msk [vmem:[#allocation2 + $0xe] sm:$0x3] %vm119_vm0, %v118_v44 }
  0x15   :  { %159 = shalt.err (!%p156_p4)
}
  0x16   :  { %s172_s28 = smov 32   ;;  %s173_s29 = smov 2  }
  0x17   :  { %139 = dma.vmem_to_hbm [thread:$0]  %s134_s27, 256, %s229_s2, [#allocation3], %s172_s28, %s172_s28, %s173_s29  }
  0x18   :  { %168 = dma.done.wait [#allocation3], 256  }
  0x19   :  { %169 = vsyncadd [#allocation3], 4294967040 }
  0x1a   :  { %143 = vsyncpa [#allocation3], 1 }

</bundles_post_ra>
